<compile_context>
chip_gen: v6e
topology: v6e:2x2x1
jax: 0.10.0
libtpu: 0.0.40
codegen_flags: <defaults>
</compile_context>

<pallas_src>
import numpy as np
import jax
import jax.numpy as jnp
from jax.experimental import pallas as pl
from jax.experimental.pallas import tpu as pltpu


# ----------------------------- Pallas kernel ------------------------------ #
def _make_decoder2_kernel(n_channel: int):
    C = n_channel

    def kernel(x_ref,
               w1_ref, b1_ref, w2_ref, b2_ref, w3_ref, b3_ref, w4_ref, b4_ref,
               u14_ref, mask2_ref, lmask_ref,
               c1w_ref, c1b_ref, gamma_ref, beta_ref, c2w_ref, c2b_ref,
               o_ref):
        f32, bf16 = jnp.float32, jnp.bfloat16

        def dense_relu(h, w_ref, b_ref):
            y = jnp.dot(h.astype(bf16), w_ref[...], preferred_element_type=f32)
            return jnp.maximum(y + b_ref[...], 0.0)

        # ---- proj: 4 x (Linear + ReLU); bf16 MXU operands, f32 accumulate ----
        h = dense_relu(x_ref[...], w1_ref, b1_ref)
        h = dense_relu(h, w2_ref, b2_ref)
        h = dense_relu(h, w3_ref, b3_ref)
        h = dense_relu(h, w4_ref, b4_ref)     # (B, C*128); channel c in cols [128c, 128c+49)

        u14 = u14_ref[...]                    # (128, 896) bf16 0/1: 7x7 -> 28x28 stride-4 scatter
        mask2 = mask2_ref[...]                # (1, 896) f32 0/1: positions reached by unpool #2
        lmask = lmask_ref[...]                # (1, 128) f32 0/1: the 49 real lanes of a block

        B = h.shape[0]
        n_map = float(B * 196)                # BatchNorm population per channel (14x14 map)
        n_const = float(B * 147)              # zero-scattered (constant-valued) positions

        def rsum(v):                          # full (1,1) f32 reduction
            return jnp.sum(jnp.sum(v, axis=1, keepdims=True), axis=0, keepdims=True)

        # Free, 128-aligned per-channel views of the MLP output.
        hblk = [h[:, c * 128:(c + 1) * 128] for c in range(C)]

        # ---- MaxUnpool(2,2) + ConvTranspose2d(C,C,1) + ReLU + BatchNorm2d ----
        # folded onto the 49-col map: the non-scattered 3/4 of the 14x14 map carries the
        # constant relu(b1[co]), so its BN contribution is closed-form.  The C^2 channel
        # mix is scalar madds on (B,49) tiles -> negligible VPU work.
        z_real, z_const = [], []
        for co in range(C):
            v = hblk[0] * c1w_ref[0 * C + co]
            for ci in range(1, C):
                v = v + hblk[ci] * c1w_ref[ci * C + co]
            v = jnp.maximum(v + c1b_ref[co], 0.0)                         # (B,128)
            v0 = jnp.maximum(jnp.zeros((1, 1), f32) + c1b_ref[co], 0.0)   # (1,1) constant value
            vm = v * lmask                                                # real lanes only
            s1 = rsum(vm) + n_const * v0                   # single-pass stats, f32 accumulate
            s2 = rsum(vm * vm) + n_const * (v0 * v0)
            mean = s1 * (1.0 / n_map)
            var = jnp.maximum(s2 * (1.0 / n_map) - mean * mean, 0.0)      # biased, clamped
            scale = gamma_ref[co] * jax.lax.rsqrt(var + 1e-5)
            shift = beta_ref[co] - mean * scale
            z_real.append(v * scale + shift)                              # (B,128)
            z_const.append(v0 * scale + shift)                            # (1,1)

        # ---- MaxUnpool(2,2) + ConvTranspose2d(C,C,1) + Sigmoid ---------------
        # conv2+sigmoid on the 49-col map; the 28x28 output is
        #   k0                       where no unpool ever wrote,
        #   k1                       at unpool-2 positions that carried z_const,
        #   sigmoid(conv2(z_real))   at the 49 stride-4 positions,
        # assembled with one tiny 0/1-scatter GEMM per channel into a lane-dense slab.
        for co in range(C):
            a = z_real[0] * c2w_ref[0 * C + co]
            ac = z_const[0] * c2w_ref[0 * C + co]
            for ci in range(1, C):
                a = a + z_real[ci] * c2w_ref[ci * C + co]
                ac = ac + z_const[ci] * c2w_ref[ci * C + co]
            sig = jax.nn.sigmoid(a + c2b_ref[co])                          # (B,128)
            k1 = jax.nn.sigmoid(ac + c2b_ref[co])                          # (1,1)
            k0 = jax.nn.sigmoid(jnp.zeros((1, 1), f32) + c2b_ref[co])      # (1,1)
            scattered = jnp.dot((sig - k1).astype(bf16), u14,
                                preferred_element_type=f32)                # (B,896)
            # TODO(synk): for large C, stack channels on the sublane axis and run one
            # (C*B,128)@(128,896) GEMM; at small C the in-kernel relayout costs more
            # than the extra MXU pushes it saves.
            o_ref[co] = scattered + ((k1 - k0) * mask2 + k0)               # unmasked (8,896) store

    return kernel


# ----------------------------- host-side constants ------------------------ #
def scatter_7_to_28() -> np.ndarray:
    """(128, 896) 0/1 scatter: 7x7 value (i,j) -> 28x28 position (4i,4j); exact in bf16.
    28x28 is flattened row-major and lane-padded 784 -> 896; rows 49..127 are zero."""
    M = np.zeros((128, 896), np.float32)
    s = np.arange(49)
    i, j = s // 7, s % 7
    M[s, (4 * i) * 28 + 4 * j] = 1.0
    return M


def mask_stride2_28() -> np.ndarray:
    """(1, 896) 0/1 indicator of the 28x28 positions (2p,2q) hit by the second unpool."""
    m = np.zeros((1, 896), np.float32)
    p = np.arange(196)
    hh, ww = p // 14, p % 14
    m[0, (2 * hh) * 28 + 2 * ww] = 1.0
    return m


def init_params(key, n_z, n_channel):
    """Original (f32, unpadded) parameters, PyTorch-style init."""
    dims = [n_z, 78, 135, 192, n_channel * 7 * 7]
    keys = jax.random.split(key, 8)
    p = {}
    for i in range(4):
        bound = 1.0 / np.sqrt(dims[i])
        p[f"w{i+1}"] = jax.random.uniform(keys[i], (dims[i], dims[i + 1]),
                                          jnp.float32, -bound, bound)
        p[f"b{i+1}"] = jax.random.uniform(jax.random.fold_in(keys[i], 1),
                                          (1, dims[i + 1]), jnp.float32, -bound, bound)
    C = n_channel
    p["ct1_w"] = jax.random.uniform(keys[4], (C, C), jnp.float32, -1.0, 1.0)  # (in, out)
    p["ct1_b"] = jax.random.uniform(keys[5], (C,), jnp.float32, -1.0, 1.0)
    p["ct2_w"] = jax.random.uniform(keys[6], (C, C), jnp.float32, -1.0, 1.0)
    p["ct2_b"] = jax.random.uniform(keys[7], (C,), jnp.float32, -1.0, 1.0)
    p["gamma"] = jnp.ones((C,), jnp.float32)       # BatchNorm2d default init
    p["beta"] = jnp.zeros((C,), jnp.float32)
    return p


def prepare_kernel_params(p, n_z, n_channel):
    """Built once host-side: lane-padded bf16 weights, bf16 scatter constant,
    f32 masks, f32 SMEM scalars."""
    C = n_channel
    dims = [n_z, 78, 135, 192, C * 49]
    pdims = [n_z, 128, 256, 256, C * 128]
    kp = {}
    for i in range(3):
        w = np.asarray(p[f"w{i+1}"], np.float32)
        b = np.asarray(p[f"b{i+1}"], np.float32).reshape(-1)
        wp = np.zeros((pdims[i], pdims[i + 1]), np.float32)
        wp[:dims[i], :dims[i + 1]] = w
        bp = np.zeros((1, pdims[i + 1]), np.float32)
        bp[0, :dims[i + 1]] = b
        kp[f"w{i+1}"] = jnp.asarray(wp, jnp.bfloat16)
        kp[f"b{i+1}"] = jnp.asarray(bp, jnp.float32)
    # layer 4: each channel's 49 output columns get their own 128-lane block,
    # so per-channel slices of h inside the kernel are free aligned views.
    w4 = np.asarray(p["w4"], np.float32)
    b4 = np.asarray(p["b4"], np.float32).reshape(-1)
    w4p = np.zeros((pdims[3], pdims[4]), np.float32)
    b4p = np.zeros((1, pdims[4]), np.float32)
    for c in range(C):
        w4p[:dims[3], c * 128:c * 128 + 49] = w4[:, c * 49:(c + 1) * 49]
        b4p[0, c * 128:c * 128 + 49] = b4[c * 49:(c + 1) * 49]
    kp["w4"] = jnp.asarray(w4p, jnp.bfloat16)
    kp["b4"] = jnp.asarray(b4p, jnp.float32)
    kp["u14"] = jnp.asarray(scatter_7_to_28(), jnp.bfloat16)   # exact in bf16
    kp["mask2"] = jnp.asarray(mask_stride2_28(), jnp.float32)
    lm = np.zeros((1, 128), np.float32)
    lm[0, :49] = 1.0
    kp["lmask49"] = jnp.asarray(lm, jnp.float32)
    kp["c1w"] = jnp.asarray(np.asarray(p["ct1_w"]).reshape(-1), jnp.float32)  # [ci*C + co]
    kp["c1b"] = jnp.asarray(p["ct1_b"], jnp.float32)
    kp["gamma"] = jnp.asarray(p["gamma"], jnp.float32)
    kp["beta"] = jnp.asarray(p["beta"], jnp.float32)
    kp["c2w"] = jnp.asarray(np.asarray(p["ct2_w"]).reshape(-1), jnp.float32)
    kp["c2b"] = jnp.asarray(p["ct2_b"], jnp.float32)
    return kp


def decoder2_forward(x, kp, n_channel):
    B = x.shape[0]
    C = n_channel
    kernel = _make_decoder2_kernel(C)
    vmem = pl.BlockSpec(memory_space=pltpu.MemorySpace.VMEM)
    smem = pl.BlockSpec(memory_space=pltpu.MemorySpace.SMEM)
    inputs = (x,
              kp["w1"], kp["b1"], kp["w2"], kp["b2"],
              kp["w3"], kp["b3"], kp["w4"], kp["b4"],
              kp["u14"], kp["mask2"], kp["lmask49"],
              kp["c1w"], kp["c1b"], kp["gamma"], kp["beta"],
              kp["c2w"], kp["c2b"])
    out = pl.pallas_call(
        kernel,
        out_shape=jax.ShapeDtypeStruct((C, B, 896), jnp.float32),  # lane-dense 896 = 7*128
        in_specs=[vmem] * 12 + [smem] * 6,
        out_specs=vmem,
    )(*inputs)
    # drop lane padding (896 -> 784), move the channel axis back, restore NCHW
    return out[:, :, :784].transpose(1, 0, 2).reshape(B, C, 28, 28)


# ----------------------------- pure-JAX reference ------------------------- #
def reference_forward(x, p, n_channel):
    h = jax.nn.relu(x @ p["w1"] + p["b1"])
    h = jax.nn.relu(h @ p["w2"] + p["b2"])
    h = jax.nn.relu(h @ p["w3"] + p["b3"])
    h = jax.nn.relu(h @ p["w4"] + p["b4"])
    B, C = x.shape[0], n_channel
    y = h.reshape(B, C, 7, 7)

    def unpool(z):
        b, c, hh, ww = z.shape
        return jnp.zeros((b, c, 2 * hh, 2 * ww), z.dtype).at[:, :, ::2, ::2].set(z)

    y = unpool(y)
    y = jnp.einsum("bihw,io->bohw", y, p["ct1_w"]) + p["ct1_b"][None, :, None, None]
    y = jax.nn.relu(y)
    mean = y.mean(axis=(0, 2, 3), keepdims=True)
    var = y.var(axis=(0, 2, 3), keepdims=True)
    y = (y - mean) / jnp.sqrt(var + 1e-5)
    y = y * p["gamma"][None, :, None, None] + p["beta"][None, :, None, None]
    y = unpool(y)
    y = jnp.einsum("bihw,io->bohw", y, p["ct2_w"]) + p["ct2_b"][None, :, None, None]
    return jax.nn.sigmoid(y)


# --------------------------------- main ----------------------------------- #
if __name__ == "__main__":
    n_z, n_channel, batch = 32, 1, 8

    key = jax.random.PRNGKey(0)
    kx, kp_key = jax.random.split(key)
    x = jax.random.normal(kx, (batch, n_z), jnp.float32)

    params = init_params(kp_key, n_z, n_channel)
    kparams = prepare_kernel_params(params, n_z, n_channel)   # built once

    out = decoder2_forward(x, kparams, n_channel)
    out = jax.block_until_ready(out)

    ref = jax.block_until_ready(reference_forward(x, params, n_channel))

    assert out.shape == (batch, n_channel, 28, 28), out.shape
    np.testing.assert_allclose(np.asarray(out), np.asarray(ref), rtol=2e-2, atol=2e-2)

    print("KERNEL_OK")
</pallas_src>

<mosaic_0001>
module attributes {stable_mosaic.version = 11 : i64} {
  func.func @kernel(%arg0: memref<8x32xf32, #tpu.memory_space<vmem>>, %arg1: memref<32x128xbf16, #tpu.memory_space<vmem>>, %arg2: memref<1x128xf32, #tpu.memory_space<vmem>>, %arg3: memref<128x256xbf16, #tpu.memory_space<vmem>>, %arg4: memref<1x256xf32, #tpu.memory_space<vmem>>, %arg5: memref<256x256xbf16, #tpu.memory_space<vmem>>, %arg6: memref<1x256xf32, #tpu.memory_space<vmem>>, %arg7: memref<256x128xbf16, #tpu.memory_space<vmem>>, %arg8: memref<1x128xf32, #tpu.memory_space<vmem>>, %arg9: memref<128x896xbf16, #tpu.memory_space<vmem>>, %arg10: memref<1x896xf32, #tpu.memory_space<vmem>>, %arg11: memref<1x128xf32, #tpu.memory_space<vmem>>, %arg12: memref<1xf32, #tpu.memory_space<smem>>, %arg13: memref<1xf32, #tpu.memory_space<smem>>, %arg14: memref<1xf32, #tpu.memory_space<smem>>, %arg15: memref<1xf32, #tpu.memory_space<smem>>, %arg16: memref<1xf32, #tpu.memory_space<smem>>, %arg17: memref<1xf32, #tpu.memory_space<smem>>, %arg18: memref<1x8x896xf32, #tpu.memory_space<vmem>>) attributes {dimension_semantics = [], scalar_prefetch = 0 : i64, scratch_operands = 0 : i64, tpu.core_type = #tpu.core_type<tc>} {
    %c0 = arith.constant 0 : index
    %c0_0 = arith.constant 0 : index
    %0 = vector.load %arg0[%c0, %c0_0] : memref<8x32xf32, #tpu.memory_space<vmem>>, vector<8x32xf32>
    %1 = arith.truncf %0 : vector<8x32xf32> to vector<8x32xbf16>
    %c0_1 = arith.constant 0 : index
    %c0_2 = arith.constant 0 : index
    %2 = vector.load %arg1[%c0_1, %c0_2] : memref<32x128xbf16, #tpu.memory_space<vmem>>, vector<32x128xbf16>
    %cst = arith.constant dense<0.000000e+00> : vector<8x128xf32>
    %3 = tpu.matmul %1, %2, %cst {dimension_numbers = #tpu.dot_dimension_numbers<[1], [0], [0], [1], [0, 0, 1, 1], [], []>} : vector<8x32xbf16>, vector<32x128xbf16>, vector<8x128xf32> -> vector<8x128xf32>
    %c0_3 = arith.constant 0 : index
    %c0_4 = arith.constant 0 : index
    %4 = vector.load %arg2[%c0_3, %c0_4] : memref<1x128xf32, #tpu.memory_space<vmem>>, vector<1x128xf32>
    %5 = vector.broadcast %4 : vector<1x128xf32> to vector<8x128xf32>
    %6 = arith.addf %3, %5 : vector<8x128xf32>
    %cst_5 = arith.constant 0.000000e+00 : f32
    %7 = vector.broadcast %cst_5 : f32 to vector<8x128xf32>
    %8 = arith.maximumf %6, %7 : vector<8x128xf32>
    %9 = arith.truncf %8 : vector<8x128xf32> to vector<8x128xbf16>
    %c0_6 = arith.constant 0 : index
    %c0_7 = arith.constant 0 : index
    %10 = vector.load %arg3[%c0_6, %c0_7] : memref<128x256xbf16, #tpu.memory_space<vmem>>, vector<128x256xbf16>
    %cst_8 = arith.constant dense<0.000000e+00> : vector<8x256xf32>
    %11 = tpu.matmul %9, %10, %cst_8 {dimension_numbers = #tpu.dot_dimension_numbers<[1], [0], [0], [1], [0, 0, 1, 1], [], []>} : vector<8x128xbf16>, vector<128x256xbf16>, vector<8x256xf32> -> vector<8x256xf32>
    %c0_9 = arith.constant 0 : index
    %c0_10 = arith.constant 0 : index
    %12 = vector.load %arg4[%c0_9, %c0_10] : memref<1x256xf32, #tpu.memory_space<vmem>>, vector<1x256xf32>
    %13 = vector.broadcast %12 : vector<1x256xf32> to vector<8x256xf32>
    %14 = arith.addf %11, %13 : vector<8x256xf32>
    %cst_11 = arith.constant 0.000000e+00 : f32
    %15 = vector.broadcast %cst_11 : f32 to vector<8x256xf32>
    %16 = arith.maximumf %14, %15 : vector<8x256xf32>
    %17 = arith.truncf %16 : vector<8x256xf32> to vector<8x256xbf16>
    %c0_12 = arith.constant 0 : index
    %c0_13 = arith.constant 0 : index
    %18 = vector.load %arg5[%c0_12, %c0_13] : memref<256x256xbf16, #tpu.memory_space<vmem>>, vector<256x256xbf16>
    %cst_14 = arith.constant dense<0.000000e+00> : vector<8x256xf32>
    %19 = tpu.matmul %17, %18, %cst_14 {dimension_numbers = #tpu.dot_dimension_numbers<[1], [0], [0], [1], [0, 0, 1, 1], [], []>} : vector<8x256xbf16>, vector<256x256xbf16>, vector<8x256xf32> -> vector<8x256xf32>
    %c0_15 = arith.constant 0 : index
    %c0_16 = arith.constant 0 : index
    %20 = vector.load %arg6[%c0_15, %c0_16] : memref<1x256xf32, #tpu.memory_space<vmem>>, vector<1x256xf32>
    %21 = vector.broadcast %20 : vector<1x256xf32> to vector<8x256xf32>
    %22 = arith.addf %19, %21 : vector<8x256xf32>
    %cst_17 = arith.constant 0.000000e+00 : f32
    %23 = vector.broadcast %cst_17 : f32 to vector<8x256xf32>
    %24 = arith.maximumf %22, %23 : vector<8x256xf32>
    %25 = arith.truncf %24 : vector<8x256xf32> to vector<8x256xbf16>
    %c0_18 = arith.constant 0 : index
    %c0_19 = arith.constant 0 : index
    %26 = vector.load %arg7[%c0_18, %c0_19] : memref<256x128xbf16, #tpu.memory_space<vmem>>, vector<256x128xbf16>
    %cst_20 = arith.constant dense<0.000000e+00> : vector<8x128xf32>
    %27 = tpu.matmul %25, %26, %cst_20 {dimension_numbers = #tpu.dot_dimension_numbers<[1], [0], [0], [1], [0, 0, 1, 1], [], []>} : vector<8x256xbf16>, vector<256x128xbf16>, vector<8x128xf32> -> vector<8x128xf32>
    %c0_21 = arith.constant 0 : index
    %c0_22 = arith.constant 0 : index
    %28 = vector.load %arg8[%c0_21, %c0_22] : memref<1x128xf32, #tpu.memory_space<vmem>>, vector<1x128xf32>
    %29 = vector.broadcast %28 : vector<1x128xf32> to vector<8x128xf32>
    %30 = arith.addf %27, %29 : vector<8x128xf32>
    %cst_23 = arith.constant 0.000000e+00 : f32
    %31 = vector.broadcast %cst_23 : f32 to vector<8x128xf32>
    %32 = arith.maximumf %30, %31 : vector<8x128xf32>
    %c0_24 = arith.constant 0 : index
    %c0_25 = arith.constant 0 : index
    %33 = vector.load %arg9[%c0_24, %c0_25] : memref<128x896xbf16, #tpu.memory_space<vmem>>, vector<128x896xbf16>
    %c0_26 = arith.constant 0 : index
    %c0_27 = arith.constant 0 : index
    %34 = vector.load %arg10[%c0_26, %c0_27] : memref<1x896xf32, #tpu.memory_space<vmem>>, vector<1x896xf32>
    %c0_28 = arith.constant 0 : index
    %c0_29 = arith.constant 0 : index
    %35 = vector.load %arg11[%c0_28, %c0_29] : memref<1x128xf32, #tpu.memory_space<vmem>>, vector<1x128xf32>
    %c0_30 = arith.constant 0 : index
    %36 = memref.load %arg12[%c0_30] : memref<1xf32, #tpu.memory_space<smem>>
    %37 = vector.broadcast %36 : f32 to vector<8x128xf32>
    %38 = arith.mulf %32, %37 : vector<8x128xf32>
    %c0_31 = arith.constant 0 : index
    %39 = memref.load %arg13[%c0_31] : memref<1xf32, #tpu.memory_space<smem>>
    %40 = vector.broadcast %39 : f32 to vector<8x128xf32>
    %41 = arith.addf %38, %40 : vector<8x128xf32>
    %cst_32 = arith.constant 0.000000e+00 : f32
    %42 = vector.broadcast %cst_32 : f32 to vector<8x128xf32>
    %43 = arith.maximumf %41, %42 : vector<8x128xf32>
    %cst_33 = arith.constant 0.000000e+00 : f32
    %44 = vector.broadcast %cst_33 : f32 to vector<1x1xf32>
    %c0_34 = arith.constant 0 : index
    %45 = memref.load %arg13[%c0_34] : memref<1xf32, #tpu.memory_space<smem>>
    %46 = vector.broadcast %45 : f32 to vector<1x1xf32>
    %47 = arith.addf %44, %46 : vector<1x1xf32>
    %cst_35 = arith.constant 0.000000e+00 : f32
    %48 = vector.broadcast %cst_35 : f32 to vector<1x1xf32>
    %49 = arith.maximumf %47, %48 : vector<1x1xf32>
    %50 = vector.broadcast %35 : vector<1x128xf32> to vector<8x128xf32>
    %51 = arith.mulf %43, %50 : vector<8x128xf32>
    %cst_36 = arith.constant dense<0.000000e+00> : vector<8xf32>
    %52 = vector.multi_reduction <add>, %51, %cst_36 [1] : vector<8x128xf32> to vector<8xf32>
    %53 = vector.shape_cast %52 : vector<8xf32> to vector<8x1xf32>
    %cst_37 = arith.constant dense<0.000000e+00> : vector<1xf32>
    %54 = vector.multi_reduction <add>, %53, %cst_37 [0] : vector<8x1xf32> to vector<1xf32>
    %55 = vector.shape_cast %54 : vector<1xf32> to vector<1x1xf32>
    %cst_38 = arith.constant 1.176000e+03 : f32
    %56 = vector.broadcast %cst_38 : f32 to vector<1x1xf32>
    %57 = arith.mulf %56, %49 : vector<1x1xf32>
    %58 = arith.addf %55, %57 : vector<1x1xf32>
    %59 = arith.mulf %51, %51 : vector<8x128xf32>
    %cst_39 = arith.constant dense<0.000000e+00> : vector<8xf32>
    %60 = vector.multi_reduction <add>, %59, %cst_39 [1] : vector<8x128xf32> to vector<8xf32>
    %61 = vector.shape_cast %60 : vector<8xf32> to vector<8x1xf32>
    %cst_40 = arith.constant dense<0.000000e+00> : vector<1xf32>
    %62 = vector.multi_reduction <add>, %61, %cst_40 [0] : vector<8x1xf32> to vector<1xf32>
    %63 = vector.shape_cast %62 : vector<1xf32> to vector<1x1xf32>
    %64 = arith.mulf %49, %49 : vector<1x1xf32>
    %cst_41 = arith.constant 1.176000e+03 : f32
    %65 = vector.broadcast %cst_41 : f32 to vector<1x1xf32>
    %66 = arith.mulf %65, %64 : vector<1x1xf32>
    %67 = arith.addf %63, %66 : vector<1x1xf32>
    %cst_42 = arith.constant 6.37755089E-4 : f32
    %68 = vector.broadcast %cst_42 : f32 to vector<1x1xf32>
    %69 = arith.mulf %58, %68 : vector<1x1xf32>
    %cst_43 = arith.constant 6.37755089E-4 : f32
    %70 = vector.broadcast %cst_43 : f32 to vector<1x1xf32>
    %71 = arith.mulf %67, %70 : vector<1x1xf32>
    %72 = arith.mulf %69, %69 : vector<1x1xf32>
    %73 = arith.subf %71, %72 : vector<1x1xf32>
    %cst_44 = arith.constant 0.000000e+00 : f32
    %74 = vector.broadcast %cst_44 : f32 to vector<1x1xf32>
    %75 = arith.maximumf %73, %74 : vector<1x1xf32>
    %c0_45 = arith.constant 0 : index
    %76 = memref.load %arg14[%c0_45] : memref<1xf32, #tpu.memory_space<smem>>
    %cst_46 = arith.constant 9.99999974E-6 : f32
    %77 = vector.broadcast %cst_46 : f32 to vector<1x1xf32>
    %78 = arith.addf %75, %77 : vector<1x1xf32>
    %79 = math.rsqrt %78 : vector<1x1xf32>
    %80 = vector.broadcast %76 : f32 to vector<1x1xf32>
    %81 = arith.mulf %80, %79 : vector<1x1xf32>
    %c0_47 = arith.constant 0 : index
    %82 = memref.load %arg15[%c0_47] : memref<1xf32, #tpu.memory_space<smem>>
    %83 = arith.mulf %69, %81 : vector<1x1xf32>
    %84 = vector.broadcast %82 : f32 to vector<1x1xf32>
    %85 = arith.subf %84, %83 : vector<1x1xf32>
    %86 = vector.broadcast %81 : vector<1x1xf32> to vector<8x128xf32>
    %87 = arith.mulf %43, %86 : vector<8x128xf32>
    %88 = vector.broadcast %85 : vector<1x1xf32> to vector<8x128xf32>
    %89 = arith.addf %87, %88 : vector<8x128xf32>
    %90 = arith.mulf %49, %81 : vector<1x1xf32>
    %91 = arith.addf %90, %85 : vector<1x1xf32>
    %c0_48 = arith.constant 0 : index
    %92 = memref.load %arg16[%c0_48] : memref<1xf32, #tpu.memory_space<smem>>
    %93 = vector.broadcast %92 : f32 to vector<8x128xf32>
    %94 = arith.mulf %89, %93 : vector<8x128xf32>
    %c0_49 = arith.constant 0 : index
    %95 = memref.load %arg16[%c0_49] : memref<1xf32, #tpu.memory_space<smem>>
    %96 = vector.broadcast %95 : f32 to vector<1x1xf32>
    %97 = arith.mulf %91, %96 : vector<1x1xf32>
    %c0_50 = arith.constant 0 : index
    %98 = memref.load %arg17[%c0_50] : memref<1xf32, #tpu.memory_space<smem>>
    %99 = vector.broadcast %98 : f32 to vector<8x128xf32>
    %100 = arith.addf %94, %99 : vector<8x128xf32>
    %101 = arith.negf %100 : vector<8x128xf32>
    %102 = math.exp %101 : vector<8x128xf32>
    %cst_51 = arith.constant 1.000000e+00 : f32
    %103 = vector.broadcast %cst_51 : f32 to vector<8x128xf32>
    %104 = arith.addf %103, %102 : vector<8x128xf32>
    %105 = arith.divf %103, %104 : vector<8x128xf32>
    %c0_52 = arith.constant 0 : index
    %106 = memref.load %arg17[%c0_52] : memref<1xf32, #tpu.memory_space<smem>>
    %107 = vector.broadcast %106 : f32 to vector<1x1xf32>
    %108 = arith.addf %97, %107 : vector<1x1xf32>
    %109 = arith.negf %108 : vector<1x1xf32>
    %110 = math.exp %109 : vector<1x1xf32>
    %cst_53 = arith.constant 1.000000e+00 : f32
    %111 = vector.broadcast %cst_53 : f32 to vector<1x1xf32>
    %112 = arith.addf %111, %110 : vector<1x1xf32>
    %113 = arith.divf %111, %112 : vector<1x1xf32>
    %cst_54 = arith.constant 0.000000e+00 : f32
    %114 = vector.broadcast %cst_54 : f32 to vector<1x1xf32>
    %c0_55 = arith.constant 0 : index
    %115 = memref.load %arg17[%c0_55] : memref<1xf32, #tpu.memory_space<smem>>
    %116 = vector.broadcast %115 : f32 to vector<1x1xf32>
    %117 = arith.addf %114, %116 : vector<1x1xf32>
    %118 = arith.negf %117 : vector<1x1xf32>
    %119 = math.exp %118 : vector<1x1xf32>
    %cst_56 = arith.constant 1.000000e+00 : f32
    %120 = vector.broadcast %cst_56 : f32 to vector<1x1xf32>
    %121 = arith.addf %120, %119 : vector<1x1xf32>
    %122 = arith.divf %120, %121 : vector<1x1xf32>
    %123 = vector.broadcast %113 : vector<1x1xf32> to vector<8x128xf32>
    %124 = arith.subf %105, %123 : vector<8x128xf32>
    %125 = arith.truncf %124 : vector<8x128xf32> to vector<8x128xbf16>
    %cst_57 = arith.constant dense<0.000000e+00> : vector<8x896xf32>
    %126 = tpu.matmul %125, %33, %cst_57 {dimension_numbers = #tpu.dot_dimension_numbers<[1], [0], [0], [1], [0, 0, 1, 1], [], []>} : vector<8x128xbf16>, vector<128x896xbf16>, vector<8x896xf32> -> vector<8x896xf32>
    %127 = arith.subf %113, %122 : vector<1x1xf32>
    %128 = vector.broadcast %127 : vector<1x1xf32> to vector<1x896xf32>
    %129 = arith.mulf %128, %34 : vector<1x896xf32>
    %130 = vector.broadcast %122 : vector<1x1xf32> to vector<1x896xf32>
    %131 = arith.addf %129, %130 : vector<1x896xf32>
    %132 = vector.broadcast %131 : vector<1x896xf32> to vector<8x896xf32>
    %133 = arith.addf %126, %132 : vector<8x896xf32>
    %c0_58 = arith.constant 0 : index
    %c0_59 = arith.constant 0 : index
    %c0_60 = arith.constant 0 : index
    %134 = vector.load %arg18[%c0_58, %c0_59, %c0_60] : memref<1x8x896xf32, #tpu.memory_space<vmem>>, vector<1x8x896xf32>
    %135 = vector.shape_cast %134 : vector<1x8x896xf32> to vector<8x896xf32>
    %136 = vector.shape_cast %133 : vector<8x896xf32> to vector<1x8x896xf32>
    tpu.vector_store %arg18[%c0_58, %c0_59, %c0_60], %136 {strides = array<i32>} : memref<1x8x896xf32, #tpu.memory_space<vmem>>, vector<1x8x896xf32>,
    return
  }
}

</mosaic_0001>

<bundles_post_ra>
// kernel: tpu_custom_call.1
= control target key start
LH: loop header
LB: loop body
LE: loop exit
PB: predicated region body
PF: predicated region fallthrough
CT: control target
= control target key end

     0   :  { %s2232_s0 = inlined_call_operand.vmem [shape: f32[8,32], index: 0, kind: input, shape index: {}]   ;;  %s2233_s1 = inlined_call_operand.hbm [shape: bf16[32,128], index: 1, kind: input, shape index: {}]   ;;  %s2234_s2 = inlined_call_operand.hbm [shape: f32[1,128], index: 2, kind: input, shape index: {}]   ;;  %s2235_s3 = inlined_call_operand.hbm [shape: bf16[128,256], index: 3, kind: input, shape index: {}]   ;;  %s2236_s4 = inlined_call_operand.vmem [shape: f32[1,256], index: 4, kind: input, shape index: {}]   ;;  %s2237_s5 = inlined_call_operand.hbm [shape: bf16[256,256], index: 5, kind: input, shape index: {}]   ;;  %s2238_s6 = inlined_call_operand.vmem [shape: f32[1,256], index: 6, kind: input, shape index: {}]   ;;  %s2239_s7 = inlined_call_operand.hbm [shape: bf16[256,128], index: 7, kind: input, shape index: {}]   ;;  %s2240_s8 = inlined_call_operand.vmem [shape: f32[1,128], index: 8, kind: input, shape index: {}]   ;;  %s2241_s9 = inlined_call_operand.hbm [shape: bf16[128,896], index: 9, kind: input, shape index: {}]   ;;  %s2242_s10 = inlined_call_operand.vmem [shape: f32[1,896], index: 10, kind: input, shape index: {}]   ;;  %s2243_s11 = inlined_call_operand.vmem [shape: f32[1,128], index: 11, kind: input, shape index: {}]   ;;  %s2244_s12 = inlined_call_operand.<no memory space> [shape: f32[1], index: 12, kind: input, shape index: {}]   ;;  %s2245_s13 = inlined_call_operand.<no memory space> [shape: f32[1], index: 13, kind: input, shape index: {}]   ;;  %s2246_s14 = inlined_call_operand.<no memory space> [shape: f32[1], index: 14, kind: input, shape index: {}]   ;;  %s2247_s15 = inlined_call_operand.<no memory space> [shape: f32[1], index: 15, kind: input, shape index: {}]   ;;  %s2248_s16 = inlined_call_operand.<no memory space> [shape: f32[1], index: 16, kind: input, shape index: {}]   ;;  %s2249_s17 = inlined_call_operand.<no memory space> [shape: f32[1], index: 17, kind: input, shape index: {}]   ;;  %s2250_s18 = inlined_call_operand.hbm [shape: f32[1,8,896], index: 18, kind: output, shape index: {}]  }
   0x1   :  { %2251 = sst [smem:[#allocation25_spill]] %s2232_s0 }
   0x2   :  { %2252 = sst [smem:[#allocation26_spill]] %s2233_s1 }
   0x3   :  { %2253 = sst [smem:[#allocation27_spill]] %s2234_s2 }
   0x4   :  { %29 = vsyncpa [#allocation9], 0 }
   0x5   :  { %30 = vsyncpa [#allocation12], 0 }
   0x6   :  { %31 = vsyncpa [#allocation15], 0 }
   0x7   :  { %32 = vsyncpa [#allocation18], 0 }
   0x8   :  { %33 = vsyncpa [#allocation10], 0  ;;  %s2003_s27 = smov [#allocation11]  }
   0x9   :  { %s54_s28 = sshll.u32 %s2003_s27, 4  ;;  %s55_s28 = int_to_ptr.vmem [resolvable:$true] %s54_s28 }
   0xa   :  { %s1861_s29 = scalar_lea.vmem %s55_s28, 16  ;;  %s1865_s30 = scalar_lea.vmem %s55_s28, 32 }
   0xb   :  { %p1862_p0 = scmp.ne.s32.totalorder %s55_s28, %s1861_s29  ;;  %p1866_p1 = scmp.lt.s32.totalorder %s55_s28, %s55_s28 }
   0xc   :  { %p1867_p2 = scmp.lt.s32.totalorder %s1865_s30, %s1861_s29 }
   0xe   :  { %p1868_p3 = por %p1867_p2, %p1866_p1 }
  0x10   :  { %p1869_p4 = pnand %p1868_p3, %p1862_p0 }
  0x12   :  { %1872 = shalt.err (!%p1869_p4)
}
  0x13   :  { %s2254_s1 = sld [smem:[#allocation27_spill]]  ;;  %s2004_s20 = smov [#allocation14]  }
  0x14   :  { %s77_s21 = sshll.u32 %s2004_s20, 4  ;;  %s2005_s22 = smov [#allocation8]   ;;  %s78_s21 = int_to_ptr.vmem [resolvable:$true] %s77_s21 }
  0x15   :  { %s41_s2 = sshll.u32 %s2005_s22, 4  ;;  %s1881_s23 = scalar_lea.vmem %s78_s21, 4096  ;;  %s42_s2 = int_to_ptr.vmem [resolvable:$true] %s41_s2 }
  0x16   :  { %p1882_p5 = scmp.ne.s32.totalorder %s78_s21, %s1881_s23  ;;  %p1886_p6 = scmp.lt.s32.totalorder %s78_s21, %s78_s21 }
  0x17   :  { %p1887_p7 = scmp.lt.s32.totalorder %s1881_s23, %s1881_s23 }
  0x19   :  { %57 = dma.hbm_to_vmem [thread:$0]  %s2254_s1, 16, %s55_s28, [#allocation12]  }
  0x1a   :  { %p1888_p8 = por %p1887_p7, %p1886_p6 }
  0x1c   :  { %p1889_p9 = pnand %p1888_p8, %p1882_p5 }
  0x1e   :  { %1892 = shalt.err (!%p1889_p9)
}
  0x1f   :  { %s2006_s24 = smov 128   ;;  %s2007_s25 = smov 8  }
  0x20   :  { %83 = dma.hbm_to_vmem [thread:$0]  %s2237_s5, 4096, %s78_s21, [#allocation15], %s2006_s24, %s2006_s24, %s2007_s25  }
  0x21   :  { %s1901_s28 = scalar_lea.vmem %s42_s2, 256  ;;  %p1906_p11 = scmp.lt.s32.totalorder %s42_s2, %s42_s2 }
  0x22   :  { %p1902_p10 = scmp.ne.s32.totalorder %s42_s2, %s1901_s28  ;;  %p1907_p12 = scmp.lt.s32.totalorder %s1901_s28, %s1901_s28 }
  0x24   :  { %p1908_p13 = por %p1907_p12, %p1906_p11 }
  0x26   :  { %p1909_p0 = pnand %p1908_p13, %p1902_p10 }
  0x28   :  { %1912 = shalt.err (!%p1909_p0)
}
  0x29   :  { %s2008_s29 = smov 64   ;;  %s2009_s30 = smov 4  }
  0x2a   :  { %s2255_s1 = sld [smem:[#allocation26_spill]]  ;;  %s2010_s20 = smov [#allocation13]  }
  0x2b   :  { %s63_s22 = sshll.u32 %s2010_s20, 4  ;;  %s2011_s23 = smov [#allocation16]   ;;  %s64_s22 = int_to_ptr.vmem [resolvable:$true] %s63_s22 }
  0x2c   :  { %s91_s26 = sshll.u32 %s2011_s23, 4  ;;  %s1921_s5 = scalar_lea.vmem %s64_s22, 2048  ;;  %s92_s26 = int_to_ptr.vmem [resolvable:$true] %s91_s26 }
  0x2d   :  { %p1922_p1 = scmp.ne.s32.totalorder %s64_s22, %s1921_s5  ;;  %p1926_p2 = scmp.lt.s32.totalorder %s64_s22, %s64_s22 }
  0x2e   :  { %p1927_p3 = scmp.lt.s32.totalorder %s1921_s5, %s1921_s5 }
  0x30   :  { %47 = dma.hbm_to_vmem [thread:$0]  %s2255_s1, 256, %s42_s2, [#allocation9], %s2008_s29, %s2008_s29, %s2009_s30  }
  0x31   :  { %p1928_p4 = por %p1927_p3, %p1926_p2 }
  0x33   :  { %p1929_p5 = pnand %p1928_p4, %p1922_p1 }
  0x35   :  { %1932 = shalt.err (!%p1929_p5)
}
  0x36   :  { %69 = dma.hbm_to_vmem [thread:$0]  %s2235_s3, 2048, %s64_s22, [#allocation12], %s2006_s24, %s2006_s24, %s2007_s25  }
  0x37   :  { %s1941_s28 = scalar_lea.vmem %s92_s26, 2048  ;;  %p1946_p7 = scmp.lt.s32.totalorder %s92_s26, %s92_s26 }
  0x38   :  { %p1942_p6 = scmp.ne.s32.totalorder %s92_s26, %s1941_s28  ;;  %p1947_p8 = scmp.lt.s32.totalorder %s1941_s28, %s1941_s28 }
  0x3a   :  { %p1948_p9 = por %p1947_p8, %p1946_p7 }
  0x3c   :  { %p1949_p10 = pnand %p1948_p9, %p1942_p6 }
  0x3e   :  { %1952 = shalt.err (!%p1949_p10)
}
  0x3f   :  { %97 = dma.hbm_to_vmem [thread:$0]  %s2239_s7, 2048, %s92_s26, [#allocation15], %s2008_s29, %s2008_s29, %s2009_s30  }
  0x40   :  { %s2012_s19 = smov [#allocation17]  }
  0x41   :  { %s105_s1 = sshll.u32 %s2012_s19, 4  ;;  %s106_s1 = int_to_ptr.vmem [resolvable:$true] %s105_s1 }
  0x42   :  { %s1961_s20 = scalar_lea.vmem %s106_s1, 7168  ;;  %p1966_p12 = scmp.lt.s32.totalorder %s106_s1, %s106_s1 }
  0x43   :  { %p1962_p11 = scmp.ne.s32.totalorder %s106_s1, %s1961_s20  ;;  %p1967_p13 = scmp.lt.s32.totalorder %s1961_s20, %s1961_s20 }
  0x45   :  { %p1968_p0 = por %p1967_p13, %p1966_p12 }
  0x47   :  { %p1969_p1 = pnand %p1968_p0, %p1962_p11 }
  0x49   :  { %1972 = shalt.err (!%p1969_p1)
}
  0x4a   :  { %s2013_s3 = smov 448   ;;  %s2014_s24 = smov 28  }
  0x4b   :  { %111 = dma.hbm_to_vmem [thread:$0]  %s2241_s9, 7168, %s106_s1, [#allocation18], %s2013_s3, %s2013_s3, %s2014_s24  }
  0x4c   :  { %1993 = dma.done.wait [#allocation9], 256  }
  0x4d   :  { %1994 = vsyncadd [#allocation9], 4294967040 }
  0x4e   :  { %1995 = dma.done.wait [#allocation12], 2064  }
  0x4f   :  { %1996 = vsyncadd [#allocation12], 4294965232 }
  0x50   :  { %1997 = dma.done.wait [#allocation15], 6144  }
  0x51   :  { %1998 = vsyncadd [#allocation15], 4294961152 }
  0x52   :  { %1999 = dma.done.wait [#allocation18], 7168  }
  0x53   :  { %2000 = vsyncadd [#allocation18], 4294960128  ;;  %v2015_v0 = vmov 0.0   ;;  %vm2016_vm0 = vmmov 0   ;;  %v1669_v1 = vld [vmem:[#allocation8 + $0x8] sm:$0xff]   ;;  %v1670_v2 = vld [vmem:[#allocation8] sm:$0xff]  }
  0x54   :  { %1625 = vmatprep.subr.bf16.mxu0 %v2015_v0  ;;  %1629 = vmatprep.mubr.msk.bf16.mxu0 %vm2016_vm0, %v2015_v0  ;;  %s2256_s29 = sld [smem:[#allocation25_spill]]  ;;  %v1671_v4 = vld [vmem:[#allocation13 + $0x74] ss:$8 sps:$4 sm:$0xff]   ;;  %v1673_v5 = vld [vmem:[#allocation13 + $0x70] ss:$8 sps:$4 sm:$0xff]   ;;  %vm172_vm1 = vcmask 261120  }
  0x55   :  { %1626 = vmatpush3.bf16.msra.mxu0 %v1669_v1  ;;  %v1674_v6 = vld [vmem:[#allocation13 + $0x64] ss:$8 sps:$4 sm:$0xff]   ;;  %326 = vmatprep.subr.bf16.mxu1 %v1671_v4  ;;  %v1676_v8 = vld [vmem:[#allocation13 + $0x60] ss:$8 sps:$4 sm:$0xff]   ;;  %v1677_v9 = vld [vmem:[#allocation13 + $0x54] ss:$8 sps:$4 sm:$0xff]  }
  0x56   :  { %1627 = vmatprep.subr.bf16.mxu0 %v2015_v0  ;;  %327 = vmatpush1.bf16.msra.mxu1 %v1673_v5  ;;  %v1679_v10 = vld [vmem:[#allocation13 + $0x50] ss:$8 sps:$4 sm:$0xff]   ;;  %v1680_v11 = vld [vmem:[#allocation13 + $0x44] ss:$8 sps:$4 sm:$0xff]   ;;  %v1682_v12 = vld [vmem:[#allocation13 + $0x40] ss:$8 sps:$4 sm:$0xff]  }
  0x57   :  { %328 = vmatprep.subr.bf16.mxu1 %v1674_v6  ;;  %v1683_v13 = vld [vmem:[#allocation13 + $0x34] ss:$8 sps:$4 sm:$0xff]   ;;  %v1685_v14 = vld [vmem:[#allocation13 + $0x30] ss:$8 sps:$4 sm:$0xff]   ;;  %v1686_v15 = vld [vmem:[#allocation13 + $0x24] ss:$8 sps:$4 sm:$0xff]  }
  0x58   :  { %v1688_v16 = vld [vmem:[#allocation13 + $0x20] ss:$8 sps:$4 sm:$0xff]   ;;  %v1689_v17 = vld [vmem:[#allocation13 + $0x14] ss:$8 sps:$4 sm:$0xff]   ;;  %v1691_v18 = vld [vmem:[#allocation13 + $0x10] ss:$8 sps:$4 sm:$0xff]  }
  0x59   :  { %1628 = vmatpush3.bf16.msra.mxu0 %v1670_v2  ;;  %v1692_v19 = vld [vmem:[#allocation13 + $0x4] ss:$8 sps:$4 sm:$0xff]   ;;  %v1694_v20 = vld [vmem:[#allocation13] ss:$8 sps:$4 sm:$0xff]   ;;  %v2017_v21 = vmov 0   ;;  %v1743_v62 = vld [vmem:[#allocation16 + $0x78] sm:$0xff]  }
  0x5a   :  { %v147_v3 = vld [vmem:[%s2256_s29] sm:$0xff]  ;;  %329 = vmatpush1.bf16.msra.mxu1 %v1676_v8  ;;  %358 = vmatprep.mubr.bf16.mxu1 %v2017_v21  ;;  %v1698_v25 = vld [vmem:[#allocation14 + $0x60] ss:$8 sps:$4 sm:$0xff]   ;;  %v1462_v50 = vld [vmem:[#allocation11] ss:$0 sm:$0xff] }
  0x5b   :  { %v148_v7 = vpack.c.bf16 %v147_v3, %v147_v3  ;;  %330 = vmatprep.subr.bf16.mxu1 %v1677_v9  ;;  %v1695_v22 = vld [vmem:[#allocation14 + $0x70] ss:$8 sps:$4 sm:$0xff]   ;;  %v1697_v23 = vld [vmem:[#allocation14 + $0x74] ss:$8 sps:$4 sm:$0xff]   ;;  %v1700_v24 = vld [vmem:[#allocation14 + $0x64] ss:$8 sps:$4 sm:$0xff]  }
  0x5c   :  { %575 = vmatprep.subr.bf16.mxu0 %v1697_v23  ;;  %v1703_v26 = vld [vmem:[#allocation14 + $0x54] ss:$8 sps:$4 sm:$0xff]   ;;  %v1701_v27 = vld [vmem:[#allocation14 + $0x50] ss:$8 sps:$4 sm:$0xff]   ;;  %v1706_v28 = vld [vmem:[#allocation14 + $0x44] ss:$8 sps:$4 sm:$0xff]  }
  0x5d   :  { %1630 = vmatmul.mubr.msk.bf16.vlgmr.msra.gmra.mxu0 %vm172_vm1, %v148_v7  ;;  %v1704_v29 = vld [vmem:[#allocation14 + $0x40] ss:$8 sps:$4 sm:$0xff]   ;;  %v1709_v30 = vld [vmem:[#allocation14 + $0x34] ss:$8 sps:$4 sm:$0xff]   ;;  %v1707_v31 = vld [vmem:[#allocation14 + $0x30] ss:$8 sps:$4 sm:$0xff]  }
  0x5e   :  { %331 = vmatpush1.bf16.msra.mxu1 %v1679_v10  ;;  %576 = vmatpush1.bf16.msra.mxu0 %v1695_v22  ;;  %v1712_v32 = vld [vmem:[#allocation14 + $0x24] ss:$8 sps:$4 sm:$0xff]   ;;  %v1710_v33 = vld [vmem:[#allocation14 + $0x20] ss:$8 sps:$4 sm:$0xff]   ;;  %v1715_v34 = vld [vmem:[#allocation14 + $0x14] ss:$8 sps:$4 sm:$0xff]  }
  0x5f   :  { %332 = vmatprep.subr.bf16.mxu1 %v1680_v11  ;;  %577 = vmatprep.subr.bf16.mxu0 %v1700_v24  ;;  %v1713_v35 = vld [vmem:[#allocation14 + $0x10] ss:$8 sps:$4 sm:$0xff]   ;;  %v1718_v36 = vld [vmem:[#allocation14 + $0x4] ss:$8 sps:$4 sm:$0xff]   ;;  %v1716_v37 = vld [vmem:[#allocation14] ss:$8 sps:$4 sm:$0xff]   ;;  %v236_v11 = vlaneseq }
  0x60   :  { %v1721_v38 = vld [vmem:[#allocation14 + $0xf4] ss:$8 sps:$4 sm:$0xff]   ;;  %v1719_v39 = vld [vmem:[#allocation14 + $0xf0] ss:$8 sps:$4 sm:$0xff]   ;;  %v1724_v40 = vld [vmem:[#allocation14 + $0xe4] ss:$8 sps:$4 sm:$0xff]  }
  0x61   :  { %v1722_v41 = vld [vmem:[#allocation14 + $0xe0] ss:$8 sps:$4 sm:$0xff]   ;;  %v1727_v42 = vld [vmem:[#allocation14 + $0xd4] ss:$8 sps:$4 sm:$0xff]   ;;  %v1725_v43 = vld [vmem:[#allocation14 + $0xd0] ss:$8 sps:$4 sm:$0xff]  }
  0x62   :  { %333 = vmatpush1.bf16.msra.mxu1 %v1682_v12  ;;  %578 = vmatpush1.bf16.msra.mxu0 %v1698_v25  ;;  %v1730_v44 = vld [vmem:[#allocation14 + $0xc4] ss:$8 sps:$4 sm:$0xff]   ;;  %v1728_v45 = vld [vmem:[#allocation14 + $0xc0] ss:$8 sps:$4 sm:$0xff]   ;;  %v1733_v46 = vld [vmem:[#allocation14 + $0xb4] ss:$8 sps:$4 sm:$0xff]  }
  0x63   :  { %334 = vmatprep.subr.bf16.mxu1 %v1683_v13  ;;  %579 = vmatprep.subr.bf16.mxu0 %v1703_v26  ;;  %v1731_v47 = vld [vmem:[#allocation14 + $0xb0] ss:$8 sps:$4 sm:$0xff]   ;;  %v1736_v48 = vld [vmem:[#allocation14 + $0xa4] ss:$8 sps:$4 sm:$0xff]   ;;  %v1734_v49 = vld [vmem:[#allocation14 + $0xa0] ss:$8 sps:$4 sm:$0xff]  }
  0x64   :  { %v1739_v58 = vld [vmem:[#allocation14 + $0x94] ss:$8 sps:$4 sm:$0xff]   ;;  %v1737_v59 = vld [vmem:[#allocation14 + $0x90] ss:$8 sps:$4 sm:$0xff]   ;;  %v1742_v60 = vld [vmem:[#allocation14 + $0x84] ss:$8 sps:$4 sm:$0xff]  }
  0x65   :  { %v1740_v61 = vld [vmem:[#allocation14 + $0x80] ss:$8 sps:$4 sm:$0xff]   ;;  %v1744_v63 = vld [vmem:[#allocation16 + $0x38] sm:$0xff]   ;;  %v1745_v1 = vld [vmem:[#allocation16 + $0x70] sm:$0xff]   ;;  %v2140_v12 = vshrl.u32 %v236_v11, 7 }
  0x66   :  { %335 = vmatpush1.bf16.msra.mxu1 %v1685_v14  ;;  %580 = vmatpush1.bf16.msra.mxu0 %v1701_v27  ;;  %v1746_v2 = vld [vmem:[#allocation16 + $0x30] sm:$0xff]   ;;  %v1747_v3 = vld [vmem:[#allocation16 + $0x68] sm:$0xff]   ;;  %v1749_v5 = vld [vmem:[#allocation16 + $0x60] sm:$0xff]  }
  0x67   :  { %336 = vmatprep.subr.bf16.mxu1 %v1686_v15  ;;  %581 = vmatprep.subr.bf16.mxu0 %v1706_v28  ;;  %v1748_v4 = vld [vmem:[#allocation16 + $0x28] sm:$0xff]   ;;  %v1750_v6 = vld [vmem:[#allocation16 + $0x20] sm:$0xff]   ;;  %v1751_v7 = vld [vmem:[#allocation16 + $0x58] sm:$0xff]   ;;  %v2143_v13 = vsub.s32 0, %v2140_v12  ;;  %v2149_v15 = vsub.s32 1, %v2140_v12 }
  0x68   :  { %v1752_v8 = vld [vmem:[#allocation16 + $0x18] sm:$0xff]   ;;  %v1753_v9 = vld [vmem:[#allocation16 + $0x50] sm:$0xff]   ;;  %v234_v14 = vld [vmem:[%s2236_s4] sm:$0x3] }
  0x69   :  { %v1754_v10 = vld [vmem:[#allocation16 + $0x10] sm:$0xff]   ;;  %v1779_v11 = vld [vmem:[#allocation17 + $0xe4] ss:$28 sps:$4 sm:$0xff]  }
  0x6a   :  { %337 = vmatpush1.bf16.msra.mxu1 %v1688_v16  ;;  %582 = vmatpush1.bf16.msra.mxu0 %v1704_v29  ;;  %v239_v16 = vrot.slane %v234_v14, %v2143_v13  ;;  %v1755_v29 = vld [vmem:[#allocation16 + $0x48] sm:$0xff]  }
  0x6b   :  { %338 = vmatprep.subr.bf16.mxu1 %v1689_v17  ;;  %583 = vmatprep.subr.bf16.mxu0 %v1709_v30  ;;  %v243_v17 = vrot.slane %v234_v14, %v2149_v15  ;;  %v1756_v30 = vld [vmem:[#allocation16 + $0x8] sm:$0xff]  }
  0x6c   :  { %v1782_v14 = vld [vmem:[#allocation17 + $0xec] ss:$28 sps:$4 sm:$0xff]  }
  0x6e   :  { %339 = vmatpush1.bf16.msra.mxu1 %v1691_v18  ;;  %584 = vmatpush1.bf16.msra.mxu0 %v1707_v31  ;;  %v1757_v31 = vld [vmem:[#allocation16 + $0x40] sm:$0xff]  }
  0x6f   :  { %340 = vmatprep.subr.bf16.mxu1 %v1692_v19  ;;  %585 = vmatprep.subr.bf16.mxu0 %v1712_v32  ;;  %v1758_v32 = vld [vmem:[#allocation16] sm:$0xff]  }
  0x72   :  { %341 = vmatpush1.bf16.msra.mxu1 %v1694_v20  ;;  %586 = vmatpush1.bf16.msra.mxu0 %v1710_v33  ;;  %v403_v33 = vld [vmem:[%s2238_s6] sm:$0x3] }
  0x73   :  { %587 = vmatprep.subr.bf16.mxu0 %v1715_v34  ;;  %1594 = vmatprep.subr.bf16.mxu1 %v1743_v62  ;;  %v408_v34 = vrot.slane %v403_v33, %v2143_v13  ;;  %v1759_v62 = vld [vmem:[#allocation17 + $0x188] ss:$28 sps:$4 sm:$0xff]  }
  0x76   :  { %588 = vmatpush1.bf16.msra.mxu0 %v1713_v35  ;;  %v412_v35 = vrot.slane %v403_v33, %v2149_v15  ;;  %v1801_v33 = vld [vmem:[#allocation17] ss:$28 sps:$4 sm:$0xff]  }
  0x77   :  { %589 = vmatprep.subr.bf16.mxu0 %v1718_v36 }
  0x7a   :  { %590 = vmatpush1.bf16.msra.mxu0 %v1716_v37 }
  0x7b   :  { %591 = vmatprep.subr.bf16.mxu0 %v1721_v38 }
  0x7e   :  { %592 = vmatpush2.bf16.msra.mxu0 %v1719_v39 }
  0x7f   :  { %593 = vmatprep.subr.bf16.mxu0 %v1724_v40 }
  0x82   :  { %594 = vmatpush2.bf16.msra.mxu0 %v1722_v41 }
  0x83   :  { %595 = vmatprep.subr.bf16.mxu0 %v1727_v42 }
  0x86   :  { %596 = vmatpush2.bf16.msra.mxu0 %v1725_v43 }
  0x87   :  { %597 = vmatprep.subr.bf16.mxu0 %v1730_v44 }
  0x8a   :  { %598 = vmatpush2.bf16.msra.mxu0 %v1728_v45 }
  0x8b   :  { %599 = vmatprep.subr.bf16.mxu0 %v1733_v46 }
  0x8e   :  { %600 = vmatpush2.bf16.msra.mxu0 %v1731_v47  ;;  %v1514_v47 = vld [vmem:[%s2240_s8] ss:$0 sm:$0xff] }
  0x8f   :  { %601 = vmatprep.subr.bf16.mxu0 %v1736_v48 }
  0x92   :  { %602 = vmatpush2.bf16.msra.mxu0 %v1734_v49 }
  0x93   :  { %603 = vmatprep.subr.bf16.mxu0 %v1739_v58  ;;  %v1531_v58 = vld [vmem:[%s2243_s11] ss:$0 sm:$0xff] }
  0x96   :  { %604 = vmatpush2.bf16.msra.mxu0 %v1737_v59 }
  0x97   :  { %605 = vmatprep.subr.bf16.mxu0 %v1742_v60 }
  0x9a   :  { %606 = vmatpush2.bf16.msra.mxu0 %v1740_v61 }
 0x11d   :  { %v210_v51 = vpop.f32.mrf.mxu0 }
 0x11e   :  { %v211_v52 = vadd.f32 %v1462_v50, %v210_v51 }
 0x11f   :  { %v1631_v53 = vpop.f32.mrf.mxu0 }
 0x120   :  { %v216_v54 = vmax.f32 %v211_v52, 0.0  ;;  %v863_v52 = vstv %s2244_s12 }
 0x121   :  { %v213_v55 = vpop.f32.mrf.mxu0 }
 0x122   :  { %v217_v56 = vpack.c.bf16 %v216_v54, %v216_v54  ;;  %v866_v55 = vstv %s2245_s13 }
 0x123   :  { %v1632_v57 = vpop.f32.mrf.mxu0 }
 0x124   :  { %359 = vmatmul.mubr.bf16.vlgmr.msra.gmra.mxu1 %v217_v56 }
 0x125   :  { %1595 = vmatpush3.bf16.msra.mxu1 %v1744_v63  ;;  %v1761_v63 = vld [vmem:[#allocation17 + $0x18c] ss:$28 sps:$4 sm:$0xff]  }
 0x126   :  { %1596 = vmatprep.subr.bf16.mxu1 %v1745_v1  ;;  %v1762_v1 = vld [vmem:[#allocation17 + $0x190] ss:$28 sps:$4 sm:$0xff]  }
 0x129   :  { %1597 = vmatpush3.bf16.msra.mxu1 %v1746_v2  ;;  %v1764_v2 = vld [vmem:[#allocation17 + $0x194] ss:$28 sps:$4 sm:$0xff]  }
 0x12a   :  { %1598 = vmatprep.subr.bf16.mxu1 %v1747_v3  ;;  %v1767_v3 = vld [vmem:[#allocation17 + $0x154] ss:$28 sps:$4 sm:$0xff]   ;;  %1315 = vmatprep.subr.bf16.mxu0 %v1764_v2 }
 0x12d   :  { %1599 = vmatpush3.bf16.msra.mxu1 %v1748_v4  ;;  %v1770_v4 = vld [vmem:[#allocation17 + $0x15c] ss:$28 sps:$4 sm:$0xff]  }
 0x12e   :  { %1600 = vmatprep.subr.bf16.mxu1 %v1749_v5  ;;  %v1765_v5 = vld [vmem:[#allocation17 + $0x150] ss:$28 sps:$4 sm:$0xff]  }
 0x131   :  { %1601 = vmatpush3.bf16.msra.mxu1 %v1750_v6  ;;  %v1768_v6 = vld [vmem:[#allocation17 + $0x158] ss:$28 sps:$4 sm:$0xff]  }
 0x132   :  { %1602 = vmatprep.subr.bf16.mxu1 %v1751_v7  ;;  %v1773_v7 = vld [vmem:[#allocation17 + $0x11c] ss:$28 sps:$4 sm:$0xff]  }
 0x135   :  { %1603 = vmatpush3.bf16.msra.mxu1 %v1752_v8  ;;  %v1776_v8 = vld [vmem:[#allocation17 + $0x124] ss:$28 sps:$4 sm:$0xff]  }
 0x136   :  { %1604 = vmatprep.subr.bf16.mxu1 %v1753_v9  ;;  %v1771_v9 = vld [vmem:[#allocation17 + $0x118] ss:$28 sps:$4 sm:$0xff]  }
 0x139   :  { %1605 = vmatpush3.bf16.msra.mxu1 %v1754_v10  ;;  %v1774_v10 = vld [vmem:[#allocation17 + $0x120] ss:$28 sps:$4 sm:$0xff]  }
 0x13a   :  { %1606 = vmatprep.subr.bf16.mxu1 %v1755_v29  ;;  %v1795_v29 = vld [vmem:[#allocation17 + $0x38] ss:$28 sps:$4 sm:$0xff]  }
 0x13d   :  { %1607 = vmatpush3.bf16.msra.mxu1 %v1756_v30  ;;  %v1798_v30 = vld [vmem:[#allocation17 + $0x40] ss:$28 sps:$4 sm:$0xff]  }
 0x13e   :  { %1608 = vmatprep.subr.bf16.mxu1 %v1757_v31  ;;  %v1803_v31 = vld [vmem:[#allocation17 + $0x4] ss:$28 sps:$4 sm:$0xff]  }
 0x141   :  { %1609 = vmatpush3.bf16.msra.mxu1 %v1758_v32  ;;  %v1806_v32 = vld [vmem:[#allocation17 + $0xc] ss:$28 sps:$4 sm:$0xff]  }
 0x142   :  { %1274 = vmatprep.subr.bf16.mxu1 %v1761_v63 }
 0x1e4   :  { %v360_v18 = vpop.f32.mrf.mxu1 }
 0x1e5   :  { %v361_v19 = vadd.f32 %v360_v18, %v239_v16  ;;  %v1777_v16 = vld [vmem:[#allocation17 + $0xe0] ss:$28 sps:$4 sm:$0xff]   ;;  %v1785_v18 = vld [vmem:[#allocation17 + $0xac] ss:$28 sps:$4 sm:$0xff]  }
 0x1e6   :  { %v362_v20 = vpop.f32.mrf.mxu1 }
 0x1e7   :  { %v363_v22 = vadd.f32 %v362_v20, %v243_v17  ;;  %v367_v23 = vmax.f32 %v361_v19, 0.0  ;;  %v1780_v17 = vld [vmem:[#allocation17 + $0xe8] ss:$28 sps:$4 sm:$0xff]   ;;  %v1788_v19 = vld [vmem:[#allocation17 + $0xb4] ss:$28 sps:$4 sm:$0xff]  }
 0x1e8   :  { %v364_v24 = vpop.f32.mrf.mxu1  ;;  %v1783_v20 = vld [vmem:[#allocation17 + $0xa8] ss:$28 sps:$4 sm:$0xff]  }
 0x1e9   :  { %v368_v25 = vmax.f32 %v363_v22, 0.0  ;;  %v369_v28 = vpack.c.bf16 %v367_v23, %v367_v23  ;;  %v1786_v22 = vld [vmem:[#allocation17 + $0xb0] ss:$28 sps:$4 sm:$0xff]   ;;  %v1794_v24 = vld [vmem:[#allocation17 + $0x7c] ss:$28 sps:$4 sm:$0xff]  }
 0x1ea   :  { %v365_v26 = vpop.f32.mrf.mxu1  ;;  %v1791_v23 = vld [vmem:[#allocation17 + $0x74] ss:$28 sps:$4 sm:$0xff]  }
 0x1eb   :  { %v370_v27 = vpack.c.bf16 %v368_v25, %v368_v25  ;;  %v1789_v25 = vld [vmem:[#allocation17 + $0x70] ss:$28 sps:$4 sm:$0xff]   ;;  %v1792_v26 = vld [vmem:[#allocation17 + $0x78] ss:$28 sps:$4 sm:$0xff]  }
 0x1ed   :  { %607 = vmatprep.mubr.bf16.mxu0 %v370_v27  ;;  %v1797_v27 = vld [vmem:[#allocation17 + $0x3c] ss:$28 sps:$4 sm:$0xff]  }
 0x1ee   :  { %608 = vmatmul.mubr.bf16.vlgmr.msra.gmra.mxu0 %v369_v28  ;;  %v1800_v28 = vld [vmem:[#allocation17 + $0x44] ss:$28 sps:$4 sm:$0xff]  }
 0x1ef   :  { %1347 = vmatprep.mubr.bf16.mxu0 %v2017_v21  ;;  %1316 = vmatpush1.bf16.msra.mxu0 %v1762_v1  ;;  %v908_v1 = vstv %s2246_s14 }
 0x1f0   :  { %1317 = vmatprep.subr.bf16.mxu0 %v1770_v4  ;;  %v912_v4 = vstv %s2247_s15 }
 0x1f3   :  { %1318 = vmatpush1.bf16.msra.mxu0 %v1768_v6 }
 0x1f4   :  { %1319 = vmatprep.subr.bf16.mxu0 %v1776_v8 }
 0x1f7   :  { %1320 = vmatpush1.bf16.msra.mxu0 %v1774_v10 }
 0x1f8   :  { %1321 = vmatprep.subr.bf16.mxu0 %v1782_v14  ;;  %v2200_v14 = vstv %s2249_s17 }
 0x1fb   :  { %1322 = vmatpush1.bf16.msra.mxu0 %v1780_v17 }
 0x1fc   :  { %1323 = vmatprep.subr.bf16.mxu0 %v1788_v19 }
 0x1ff   :  { %1324 = vmatpush1.bf16.msra.mxu0 %v1786_v22 }
 0x200   :  { %1325 = vmatprep.subr.bf16.mxu0 %v1794_v24 }
 0x203   :  { %1326 = vmatpush1.bf16.msra.mxu0 %v1792_v26 }
 0x204   :  { %1327 = vmatprep.subr.bf16.mxu0 %v1800_v28  ;;  %v1807_v28 = vld [vmem:[#allocation17 + $0x198] ss:$28 sps:$4 sm:$0xff]  }
 0x207   :  { %1328 = vmatpush1.bf16.msra.mxu0 %v1798_v30 }
 0x208   :  { %1329 = vmatprep.subr.bf16.mxu0 %v1806_v32  ;;  %v1811_v32 = vld [vmem:[#allocation17 + $0x160] ss:$28 sps:$4 sm:$0xff]  }
 0x2ae   :  { %v609_v36 = vpop.f32.mrf.mxu0 }
 0x2af   :  { %v610_v37 = vadd.f32 %v609_v36, %v408_v34  ;;  %v1804_v34 = vld [vmem:[#allocation17 + $0x8] ss:$28 sps:$4 sm:$0xff]  }
 0x2b0   :  { %v611_v38 = vpop.f32.mrf.mxu0  ;;  %1330 = vmatpush1.bf16.msra.mxu0 %v1804_v34  ;;  %v1817_v34 = vld [vmem:[#allocation17 + $0x12c] ss:$28 sps:$4 sm:$0xff]  }
 0x2b1   :  { %v612_v39 = vadd.f32 %v611_v38, %v412_v35  ;;  %v616_v40 = vmax.f32 %v610_v37, 0.0  ;;  %v1809_v35 = vld [vmem:[#allocation17 + $0x19c] ss:$28 sps:$4 sm:$0xff]   ;;  %1633 = vmatprep.subr.bf16.mxu0 %v2015_v0 }
 0x2b2   :  { %v613_v41 = vpop.f32.mrf.mxu0 }
 0x2b3   :  { %v617_v42 = vmax.f32 %v612_v39, 0.0  ;;  %v618_v45 = vpack.c.bf16 %v616_v40, %v616_v40  ;;  %v870_v40 = vmax.f32 %v866_v55, 0.0 }
 0x2b4   :  { %v614_v43 = vpop.f32.mrf.mxu0 }
 0x2b5   :  { %v619_v44 = vpack.c.bf16 %v617_v42, %v617_v42 }
 0x2b7   :  { %787 = vmatprep.mubr.bf16.mxu1 %v619_v44 }
 0x2b8   :  { %788 = vmatmul.mubr.bf16.vlgmr.msra.gmra.mxu1 %v618_v45  ;;  %v886_v45 = vmul.f32 1176.0, %v870_v40 }
 0x2b9   :  { %1306 = vmatprep.mubr.bf16.mxu1 %v2017_v21  ;;  %1275 = vmatpush1.bf16.msra.mxu1 %v1759_v62 }
 0x2ba   :  { %1276 = vmatprep.subr.bf16.mxu1 %v1767_v3 }
 0x2bd   :  { %1277 = vmatpush1.bf16.msra.mxu1 %v1765_v5 }
 0x2be   :  { %1278 = vmatprep.subr.bf16.mxu1 %v1773_v7 }
 0x2c1   :  { %1279 = vmatpush1.bf16.msra.mxu1 %v1771_v9  ;;  %v919_v9 = vstv %s2248_s16 }
 0x2c2   :  { %1280 = vmatprep.subr.bf16.mxu1 %v1779_v11 }
 0x2c5   :  { %1281 = vmatpush1.bf16.msra.mxu1 %v1777_v16 }
 0x2c6   :  { %1282 = vmatprep.subr.bf16.mxu1 %v1785_v18 }
 0x2c9   :  { %1283 = vmatpush1.bf16.msra.mxu1 %v1783_v20 }
 0x2ca   :  { %1284 = vmatprep.subr.bf16.mxu1 %v1791_v23 }
 0x2cd   :  { %1285 = vmatpush1.bf16.msra.mxu1 %v1789_v25 }
 0x2ce   :  { %1286 = vmatprep.subr.bf16.mxu1 %v1797_v27 }
 0x2d1   :  { %1287 = vmatpush1.bf16.msra.mxu1 %v1795_v29  ;;  %v1810_v29 = vld [vmem:[#allocation17 + $0x1a0] ss:$28 sps:$4 sm:$0xff]  }
 0x2d2   :  { %1288 = vmatprep.subr.bf16.mxu1 %v1803_v31  ;;  %v1813_v31 = vld [vmem:[#allocation17 + $0x164] ss:$28 sps:$4 sm:$0xff]  }
 0x2d5   :  { %1289 = vmatpush1.bf16.msra.mxu1 %v1801_v33  ;;  %v1814_v33 = vld [vmem:[#allocation17 + $0x168] ss:$28 sps:$4 sm:$0xff]  }
 0x2d6   :  { %1356 = vmatprep.subr.bf16.mxu1 %v1809_v35  ;;  %v1815_v35 = vld [vmem:[#allocation17 + $0x128] ss:$28 sps:$4 sm:$0xff]  }
 0x378   :  { %v1610_v46 = vpop.f32.mrf.mxu1 }
 0x37a   :  { %v1611_v48 = vpop.f32.mrf.mxu1 }
 0x37b   :  { %v1612_v49 = vadd.f32 %v1611_v48, %v1610_v46 }
 0x37c   :  { %v1613_v50 = vpop.f32.mrf.mxu1 }
 0x37d   :  { %v790_v51 = vadd.f32 %v1612_v49, %v1514_v47  ;;  %v897_v47 = vmul.f32 %v870_v40, %v870_v40 }
 0x37e   :  { %v1614_v53 = vpop.f32.mrf.mxu1 }
 0x37f   :  { %v795_v54 = vmax.f32 %v790_v51, 0.0 }
 0x381   :  { %v864_v56 = vmul.f32 %v863_v52, %v795_v54  ;;  %v898_v52 = vmul.f32 1176.0, %v897_v47  ;;  %v1834_v47 = vld [vmem:[#allocation17 + $0x50] ss:$28 sps:$4 sm:$0xff]  }
 0x383   :  { %v2173_v57 = vadd.f32 %v866_v55, %v864_v56 }
 0x385   :  { %v868_v59 = vmax.f32 %v2173_v57, 0.0 }
 0x387   :  { %v877_v60 = vmul.f32 %v1531_v58, %v868_v59 }
 0x389   :  { %878 = vadd.xlane.f32.xlu0 %v877_v60  ;;  %v888_v61 = vmul.f32 %v877_v60, %v877_v60 }
 0x38d   :  { %889 = vadd.xlane.f32.xlu0 %v888_v61 }
 0x412   :  { %v879_v36 = vpop.xlane.xlu0 %878 }
 0x413   :  { %v880_v37 = vrot.slane %v879_v36, 4 }
 0x415   :  { %v881_v38 = vadd.f32 %v880_v37, %v879_v36  ;;  %v1818_v36 = vld [vmem:[#allocation17 + $0x130] ss:$28 sps:$4 sm:$0xff]  }
 0x416   :  { %v890_v39 = vpop.xlane.xlu0 %889  ;;  %v1821_v37 = vld [vmem:[#allocation17 + $0xf4] ss:$28 sps:$4 sm:$0xff]  }
 0x417   :  { %v882_v41 = vrot.slane %v881_v38, 2  ;;  %v891_v42 = vrot.slane %v890_v39, 4 }
 0x419   :  { %v883_v43 = vadd.f32 %v882_v41, %v881_v38  ;;  %v892_v44 = vadd.f32 %v891_v42, %v890_v39  ;;  %v1819_v38 = vld [vmem:[#allocation17 + $0xf0] ss:$28 sps:$4 sm:$0xff]   ;;  %v1822_v39 = vld [vmem:[#allocation17 + $0xf8] ss:$28 sps:$4 sm:$0xff]   ;;  %v1826_v41 = vld [vmem:[#allocation17 + $0xc0] ss:$28 sps:$4 sm:$0xff]  }
 0x41a   :  { %v1829_v42 = vld [vmem:[#allocation17 + $0x84] ss:$28 sps:$4 sm:$0xff]  }
 0x41b   :  { %v884_v46 = vrot.slane %v883_v43, 1  ;;  %v893_v48 = vrot.slane %v892_v44, 2 }
 0x41d   :  { %v885_v49 = vadd.f32 %v884_v46, %v883_v43  ;;  %v894_v50 = vadd.f32 %v893_v48, %v892_v44  ;;  %v1827_v43 = vld [vmem:[#allocation17 + $0x80] ss:$28 sps:$4 sm:$0xff]   ;;  %v1830_v44 = vld [vmem:[#allocation17 + $0x88] ss:$28 sps:$4 sm:$0xff]   ;;  %v1837_v48 = vld [vmem:[#allocation17 + $0x14] ss:$28 sps:$4 sm:$0xff]  }
 0x41e   :  { %v1831_v46 = vld [vmem:[#allocation17 + $0x48] ss:$28 sps:$4 sm:$0xff]  }
 0x41f   :  { %v887_v51 = vadd.f32 %v886_v45, %v885_v49  ;;  %v895_v53 = vrot.slane %v894_v50, 1  ;;  %v1833_v45 = vld [vmem:[#allocation17 + $0x4c] ss:$28 sps:$4 sm:$0xff]  }
 0x420   :  { %v1835_v49 = vld [vmem:[#allocation17 + $0x10] ss:$28 sps:$4 sm:$0xff]  }
 0x421   :  { %v900_v54 = vmul.f32 0.0006377551, %v887_v51  ;;  %v896_v56 = vadd.f32 %v895_v53, %v894_v50  ;;  %v1838_v50 = vld [vmem:[#allocation17 + $0x18] ss:$28 sps:$4 sm:$0xff]   ;;  %v1534_v51 = vmul.f32 -1.442695, %v2200_v14 }
 0x423   :  { %v899_v58 = vadd.f32 %v898_v52, %v896_v56  ;;  %v902_v60 = vmul.f32 %v900_v54, %v900_v54 }
 0x425   :  { %v901_v61 = vmul.f32 0.0006377551, %v899_v58  ;;  %v860_v58 = vld [vmem:[%s2242_s10] sm:$0xff]  ;;  %s2018_s10 = smov [#allocation19]  }
 0x426   :  { %s1450_s17 = sshll.u32 %s2018_s10, 4  ;;  %s1451_s17 = int_to_ptr.vmem [resolvable:$true] %s1450_s17 }
 0x427   :  { %v903_v62 = vsub.f32 %v901_v61, %v902_v60  ;;  %s1973_s9 = scalar_lea.vmem %s1451_s17, 896  ;;  %p1978_p3 = scmp.lt.s32.totalorder %s1451_s17, %s1451_s17 }
 0x428   :  { %p1974_p2 = scmp.ne.s32.totalorder %s1451_s17, %s1973_s9  ;;  %p1979_p4 = scmp.lt.s32.totalorder %s1973_s9, %s1973_s9 }
 0x429   :  { %v904_v55 = vmax.f32 %v903_v62, 0.0  ;;  %v965_v62 = vsub.s32 3, %v2140_v12 }
 0x42a   :  { %p1980_p5 = por %p1979_p4, %p1978_p3 }
 0x42b   :  { %v906_v63 = vadd.f32 1e-05, %v904_v55 }
 0x42c   :  { %p1981_p6 = pnand %p1980_p5, %p1974_p2 }
 0x42d   :  { %1839 = vrsqrt.f32 %v906_v63 }
 0x43a   :  { %v1840_v2 = vpop.eup %1839 }
 0x43b   :  { %v909_v3 = vmul.f32 %v1840_v2, %v908_v1 }
 0x43d   :  { %v911_v5 = vmul.f32 %v909_v3, %v900_v54  ;;  %v914_v7 = vmul.f32 %v909_v3, %v868_v59  ;;  %v916_v8 = vmul.f32 %v909_v3, %v870_v40  ;;  %v1825_v40 = vld [vmem:[#allocation17 + $0xbc] ss:$28 sps:$4 sm:$0xff]  }
 0x43f   :  { %v913_v6 = vsub.f32 %v912_v4, %v911_v5 }
 0x441   :  { %v915_v10 = vadd.f32 %v914_v7, %v913_v6  ;;  %v917_v11 = vadd.f32 %v916_v8, %v913_v6 }
 0x443   :  { %v920_v16 = vmul.f32 %v919_v9, %v915_v10  ;;  %v921_v17 = vmul.f32 %v919_v9, %v917_v11 }
 0x445   :  { %v924_v18 = vadd.f32 %v2200_v14, %v920_v16  ;;  %v931_v19 = vadd.f32 %v2200_v14, %v921_v17  ;;  %v969_v17 = vsub.s32 4, %v2140_v12 }
 0x447   :  { %v1532_v57 = vmul.f32 -1.442695, %v924_v18  ;;  %v1533_v59 = vmul.f32 -1.442695, %v931_v19  ;;  %v977_v18 = vsub.s32 6, %v2140_v12  ;;  %v973_v19 = vsub.s32 5, %v2140_v12 }
 0x449   :  { %1841 = vpow2.f32 %v1532_v57 }
 0x44a   :  { %1843 = vpow2.f32 %v1533_v59 }
 0x456   :  { %v1842_v20 = vpop.eup %1841 }
 0x457   :  { %v1844_v22 = vpop.eup %1843  ;;  %v928_v23 = vadd.f32 1.0, %v1842_v20 }
 0x458   :  { %v935_v24 = vadd.f32 1.0, %v1844_v22 }
 0x459   :  { %1845 = vrcp.f32 %v928_v23 }
 0x45a   :  { %1847 = vrcp.f32 %v935_v24 }
 0x45b   :  { %1849 = vpow2.f32 %v1534_v51 }
 0x466   :  { %v1846_v25 = vpop.eup %1845 }
 0x467   :  { %v2204_v26 = vpop.eup %1847 }
 0x468   :  { %v945_v27 = vsub.f32 %v1846_v25, %v2204_v26  ;;  %v1850_v52 = vpop.eup %1849 }
 0x469   :  { %v942_v53 = vadd.f32 1.0, %v1850_v52 }
 0x46a   :  { %v946_v30 = vpack.c.bf16 %v945_v27, %v945_v27 }
 0x46b   :  { %1851 = vrcp.f32 %v942_v53 }
 0x46c   :  { %1307 = vmatmul.mubr.bf16.vlgmr.msra.gmra.mxu1 %v946_v30  ;;  %1348 = vmatmul.mubr.bf16.vlgmr.msra.gmra.mxu0 %v946_v30 }
 0x46d   :  { %1357 = vmatpush1.bf16.msra.mxu1 %v1807_v28  ;;  %1634 = vmatpush3.bf16.msra.mxu0 %v1810_v29 }
 0x46e   :  { %1358 = vmatprep.subr.bf16.mxu1 %v1813_v31  ;;  %1635 = vmatprep.subr.bf16.mxu0 %v2015_v0 }
 0x46f   :  { %1388 = vmatprep.mubr.bf16.mxu1 %v2017_v21  ;;  %1649 = vmatprep.mubr.msk.bf16.mxu0 %vm2016_vm0, %v2015_v0  ;;  %v1823_v21 = vld [vmem:[#allocation17 + $0xb8] ss:$28 sps:$4 sm:$0xff]  }
 0x471   :  { %1359 = vmatpush1.bf16.msra.mxu1 %v1811_v32  ;;  %1636 = vmatpush3.bf16.msra.mxu0 %v1814_v33 }
 0x472   :  { %1360 = vmatprep.subr.bf16.mxu1 %v1817_v34  ;;  %1637 = vmatprep.subr.bf16.mxu0 %v2015_v0 }
 0x475   :  { %1361 = vmatpush1.bf16.msra.mxu1 %v1815_v35  ;;  %1638 = vmatpush3.bf16.msra.mxu0 %v1818_v36 }
 0x476   :  { %1362 = vmatprep.subr.bf16.mxu1 %v1821_v37  ;;  %1639 = vmatprep.subr.bf16.mxu0 %v2015_v0 }
 0x478   :  { %v1852_v54 = vpop.eup %1851 }
 0x479   :  { %1363 = vmatpush1.bf16.msra.mxu1 %v1819_v38  ;;  %1640 = vmatpush3.bf16.msra.mxu0 %v1822_v39  ;;  %v947_v56 = vsub.f32 %v2204_v26, %v1852_v54 }
 0x47a   :  { %1364 = vmatprep.subr.bf16.mxu1 %v1825_v40  ;;  %1641 = vmatprep.subr.bf16.mxu0 %v2015_v0 }
 0x47b   :  { %v948_v60 = vmul.f32 %v947_v56, %v860_v58 }
 0x47d   :  { %1365 = vmatpush1.bf16.msra.mxu1 %v1823_v21  ;;  %1642 = vmatpush3.bf16.msra.mxu0 %v1826_v41  ;;  %v949_v61 = vadd.f32 %v1852_v54, %v948_v60 }
 0x47e   :  { %1366 = vmatprep.subr.bf16.mxu1 %v1829_v42  ;;  %1643 = vmatprep.subr.bf16.mxu0 %v2015_v0 }
 0x47f   :  { %v954_v55 = vrot.slane %v949_v61, %v2143_v13  ;;  %v958_v5 = vrot.slane %v949_v61, %v2149_v15  ;;  %v966_v6 = vrot.slane %v949_v61, %v965_v62  ;;  %v970_v15 = vrot.slane %v949_v61, %v969_v17 }
 0x480   :  { %v978_v57 = vrot.slane %v949_v61, %v977_v18  ;;  %v974_v24 = vrot.slane %v949_v61, %v973_v19 }
 0x481   :  { %1367 = vmatpush1.bf16.msra.mxu1 %v1827_v43  ;;  %1644 = vmatpush3.bf16.msra.mxu0 %v1830_v44 }
 0x482   :  { %1368 = vmatprep.subr.bf16.mxu1 %v1833_v45  ;;  %1645 = vmatprep.subr.bf16.mxu0 %v2015_v0 }
 0x485   :  { %1369 = vmatpush1.bf16.msra.mxu1 %v1831_v46  ;;  %1646 = vmatpush3.bf16.msra.mxu0 %v1834_v47 }
 0x486   :  { %1370 = vmatprep.subr.bf16.mxu1 %v1837_v48  ;;  %1647 = vmatprep.subr.bf16.mxu0 %v2015_v0  ;;  %v961_v0 = vsub.s32 2, %v2140_v12 }
 0x488   :  { %v962_v63 = vrot.slane %v949_v61, %v961_v0 }
 0x489   :  { %1371 = vmatpush1.bf16.msra.mxu1 %v1835_v49  ;;  %1648 = vmatpush3.bf16.msra.mxu0 %v1838_v50 }
 0x48c   :  { %1389 = vmatmul.mubr.bf16.vlgmr.msra.gmra.mxu1 %v946_v30  ;;  %1650 = vmatmul.mubr.bf16.vlgmr.msra.gmra.mxu0 %v946_v30 }
 0x52c   :  { %v1308_v1 = vpop.f32.mrf.mxu1  ;;  %v1349_v2 = vpop.f32.mrf.mxu0 }
 0x52d   :  { %v1309_v3 = vadd.f32 %v1308_v1, %v954_v55  ;;  %v1350_v4 = vadd.f32 %v1349_v2, %v962_v63 }
 0x52e   :  { %v1310_v7 = vpop.f32.mrf.mxu1  ;;  %v1351_v8 = vpop.f32.mrf.mxu0 }
 0x52f   :  { %1437 = vst [vmem:[#allocation19] sm:$0xff] %v1309_v3  ;;  %1439 = vst [vmem:[#allocation19 + $0x10] sm:$0xff] %v1350_v4  ;;  %v1311_v9 = vadd.f32 %v1310_v7, %v958_v5  ;;  %v1352_v10 = vadd.f32 %v1351_v8, %v966_v6 }
 0x530   :  { %v1312_v11 = vpop.f32.mrf.mxu1  ;;  %v1353_v14 = vpop.f32.mrf.mxu0 }
 0x531   :  { %1438 = vst [vmem:[#allocation19 + $0x8] sm:$0xff] %v1311_v9  ;;  %1440 = vst [vmem:[#allocation19 + $0x18] sm:$0xff] %v1352_v10 }
 0x532   :  { %v1313_v16 = vpop.f32.mrf.mxu1  ;;  %v1354_v13 = vpop.f32.mrf.mxu0 }
 0x54c   :  { %v1390_v59 = vpop.f32.mrf.mxu1  ;;  %v1431_v20 = vpop.f32.mrf.mxu0 }
 0x54d   :  { %v1391_v22 = vadd.f32 %v1390_v59, %v970_v15  ;;  %v1432_v23 = vadd.f32 %v1431_v20, %v978_v57 }
 0x54e   :  { %v1392_v25 = vpop.f32.mrf.mxu1  ;;  %v1651_v26 = vpop.f32.mrf.mxu0 }
 0x54f   :  { %1441 = vst [vmem:[#allocation19 + $0x20] sm:$0xff] %v1391_v22  ;;  %1443 = vst [vmem:[#allocation19 + $0x30] sm:$0xff] %v1432_v23  ;;  %v1393_v27 = vadd.f32 %v1392_v25, %v974_v24 }
 0x550   :  { %v1394_v28 = vpop.f32.mrf.mxu1  ;;  %v1434_v29 = vpop.f32.mrf.mxu0 }
 0x551   :  { %1442 = vst [vmem:[#allocation19 + $0x28] sm:$0xff] %v1393_v27 }
 0x552   :  { %v1395_v30 = vpop.f32.mrf.mxu1  ;;  %v1652_v12 = vpop.f32.mrf.mxu0 }
 0x553   :  { %1984 = shalt.err (!%p1981_p6)
}
 0x554   :  { %1453 = dma.vmem_to_hbm [thread:$0]  %s1451_s17, 896, %s2250_s18, [#allocation10]  }
 0x555   :  { %2001 = dma.done.wait [#allocation10], 896  }
 0x556   :  { %2002 = vsyncadd [#allocation10], 4294966400 }
 0x557   :  { %1457 = vsyncpa [#allocation9], 1 }
 0x558   :  { %1458 = vsyncpa [#allocation12], 1 }
 0x559   :  { %1459 = vsyncpa [#allocation15], 1 }
 0x55a   :  { %1460 = vsyncpa [#allocation18], 1 }
 0x55b   :  { %1461 = vsyncpa [#allocation10], 1 }

</bundles_post_ra>
